<compile_context>
chip_gen: v7x
topology: tpu7x:2x2x1
jax: 0.10.0
libtpu: 0.0.40
codegen_flags: <defaults>
</compile_context>

<pallas_src>
import math

import jax
import jax.numpy as jnp
from jax.experimental import pallas as pl
from jax.experimental.pallas import tpu as pltpu


# ---------------------------------------------------------------------------
# Tiling policy
# ---------------------------------------------------------------------------
_ELEM_TARGET_ELEMS = 512 * 1024     # ~2 MiB f32 blocks (3 arrays in flight)
_PAIR_TARGET_ELEMS = 1024 * 2048    # ~8 MiB f32 blocks (output-write dominated)
_ELEM_MAX_TN = 1024
_PAIR_MAX_TN = 2048
_MAX_FLAT_LANES = 4096


def _cdiv(a, b):
    return -(-a // b)


def _round_up(a, b):
    return _cdiv(a, b) * b


# ---------------------------------------------------------------------------
# Kernel bodies
# ---------------------------------------------------------------------------
def _body_standard(params_ref, a_ref, b_ref, o_ref):
    """params = [c1, c2] with c1 = -2*pi^2*sigma^2, c2 = 2*pi*mu."""
    c1 = params_ref[0]
    c2 = params_ref[1]
    d = a_ref[...] - b_ref[...]     # (tm,1)/(1,tn)/(1,1) blocks broadcast here
    o_ref[...] = (jnp.exp(c1 * (d * d)) * jnp.cos(c2 * d)).astype(o_ref.dtype)


def _body_prescaled(params_ref, a_ref, b_ref, o_ref):
    """params = [c1/c2^2, c2]; both operands are thin row/col vectors, so
    scaling them *before* the broadcast costs O(tm+tn) multiplies instead of a
    full-tile multiply for c2*d -> one fewer VALU op per output element."""
    c1p = params_ref[0]
    c2 = params_ref[1]
    d = a_ref[...] * c2 - b_ref[...] * c2
    o_ref[...] = (jnp.exp(c1p * (d * d)) * jnp.cos(d)).astype(o_ref.dtype)


# ---------------------------------------------------------------------------
# Broadcast planning (copy-free 2-D collapse of the PyTorch broadcast)
# ---------------------------------------------------------------------------
def _plan_flat(total):
    """Pick (rows, lanes, padded_total) so the flat slab is lane-dense
    (lanes % 128 == 0) and sublane-dense (rows % 8 == 0), padding if needed."""
    lanes = min(_MAX_FLAT_LANES, (total // 128) * 128) if total >= 128 else 0
    while lanes >= 128:
        if total % lanes == 0:
            rows = total // lanes
            if rows >= 8 and rows % 8 == 0:
                return rows, lanes, total
        lanes -= 128
    padded = _round_up(max(total, 1), 8 * 128)
    lanes = min(_MAX_FLAT_LANES, padded)
    while lanes >= 128:
        if padded % lanes == 0:
            rows = padded // lanes
            if rows >= 8 and rows % 8 == 0:
                return rows, lanes, padded
        lanes -= 128
    return 8, 128, _round_up(max(total, 1), 1024)   # unreachable in practice


def _broadcast_plan(s1, s2, out_shape):
    """Return (R, C, a_shape2, b_shape2, pad) such that each input can be
    reshaped *without copies* to a_shape2/b_shape2 in {(R,C),(R,1),(1,C),(1,1)}
    and out_shape collapses to (R, C). Returns None if no single-split
    decomposition exists."""
    nd = len(out_shape)
    out = tuple(out_shape)
    a = (1,) * (nd - len(s1)) + tuple(s1)
    b = (1,) * (nd - len(s2)) + tuple(s2)
    total = math.prod(out) if out else 1

    def covers(s):
        return s == out

    def is_scalar(s):
        return all(d == 1 for d in s)

    # Case A: both operands are full copies of the output (or scalars) -> free
    # to pick any dense flat factorization (plus padding for odd sizes).
    if (covers(a) or is_scalar(a)) and (covers(b) or is_scalar(b)):
        rows, lanes, padded = _plan_flat(total)
        sa = (rows, lanes) if covers(a) else (1, 1)
        sb = (rows, lanes) if covers(b) else (1, 1)
        return rows, lanes, sa, sb, padded - total

    # Case B: split the (aligned) output axes into a leading and a trailing
    # group such that each operand either spans a group fully or broadcasts
    # over it; the broadcast then happens inside the kernel.
    def kind(s, lo, hi):
        if all(s[i] == out[i] for i in range(lo, hi)):
            return "full"
        if all(s[i] == 1 for i in range(lo, hi)):
            return "bcast"
        return None

    best = None
    for k in range(1, nd):
        kinds = (kind(a, 0, k), kind(a, k, nd), kind(b, 0, k), kind(b, k, nd))
        if None in kinds:
            continue
        R = math.prod(out[:k])
        C = math.prod(out[k:])
        sa = (R if kinds[0] == "full" else 1, C if kinds[1] == "full" else 1)
        sb = (R if kinds[2] == "full" else 1, C if kinds[3] == "full" else 1)
        score = (C % 128 == 0, R % 8 == 0, min(R, C))
        if best is None or score > best[0]:
            best = (score, (R, C, sa, sb, 0))
    return None if best is None else best[1]


def _as_2d(x, shape2, pad):
    """Reshape x to shape2; full-output operands get flat-padded first."""
    if x.size == shape2[0] * shape2[1]:
        return x.reshape(shape2)
    flat = jnp.pad(x.reshape(-1), (0, pad))
    return flat.reshape(shape2)


# ---------------------------------------------------------------------------
# Launch
# ---------------------------------------------------------------------------
def _choose_tiles(R, C, thin):
    target, max_tn = ((_PAIR_TARGET_ELEMS, _PAIR_MAX_TN) if thin
                      else (_ELEM_TARGET_ELEMS, _ELEM_MAX_TN))
    tn = C if C <= max_tn else max_tn                 # full extent or mult of 128
    want_tm = max(8, _round_up(max(target // max(tn, 1), 1), 8))
    tm = R if R <= want_tm else want_tm               # full extent or mult of 8

    # v7x has 2 TensorCores fed via the "parallel" grid axes: if the whole
    # problem fits one block, split one axis so both cores get work.
    if _cdiv(R, tm) == 1 and _cdiv(C, tn) == 1:
        if R >= 16:
            tm = _round_up(_cdiv(R, 2), 8)
        elif C >= 256:
            tn = _round_up(_cdiv(C, 2), 128)
    return tm, tn


def _operand_spec(shape2, tm, tn):
    rows_full = shape2[0] != 1
    cols_full = shape2[1] != 1
    block = (tm if rows_full else 1, tn if cols_full else 1)
    if rows_full and cols_full:
        imap = lambda i, j: (i, j)
    elif rows_full:
        imap = lambda i, j: (i, 0)
    elif cols_full:
        imap = lambda i, j: (0, j)
    else:
        imap = lambda i, j: (0, 0)
    return pl.BlockSpec(block, imap)


def _vmem_limit_bytes(block_elems):
    # double-buffered f32 pipeline buffers + headroom for Mosaic temporaries.
    buffered = block_elems * 4 * 2
    return int(min(max(buffered + (12 << 20), 24 << 20), 48 << 20))


def _launch(params, a2, b2, R, C, thin, prescale, out_dtype):
    tm, tn = _choose_tiles(R, C, thin)
    grid = (_cdiv(R, tm), _cdiv(C, tn))

    def blk_elems(shape2):
        return (tm if shape2[0] != 1 else 1) * (tn if shape2[1] != 1 else 1)

    block_elems = tm * tn + blk_elems(a2.shape) + blk_elems(b2.shape)
    body = _body_prescaled if prescale else _body_standard

    return pl.pallas_call(
        body,
        out_shape=jax.ShapeDtypeStruct((R, C), out_dtype),
        grid=grid,
        in_specs=[
            pl.BlockSpec(memory_space=pltpu.MemorySpace.SMEM),   # [c1, c2]
            _operand_spec(a2.shape, tm, tn),
            _operand_spec(b2.shape, tm, tn),
        ],
        out_specs=pl.BlockSpec((tm, tn), lambda i, j: (i, j)),
        compiler_params=pltpu.CompilerParams(
            dimension_semantics=("parallel", "parallel"),
            vmem_limit_bytes=_vmem_limit_bytes(block_elems),
        ),
    )(params, a2, b2)


# ---------------------------------------------------------------------------
# Public wrapper (CosineKernel.forward)
# ---------------------------------------------------------------------------
def _concrete_float(x):
    try:
        return float(x)
    except Exception:       # traced value -> unknown at trace time
        return None


def _params(sigma, mu, prescale):
    sigma = jnp.asarray(sigma, jnp.float32)
    mu = jnp.asarray(mu, jnp.float32)
    c2 = 2.0 * jnp.pi * mu
    if prescale:
        c1 = -0.5 * (sigma / mu) ** 2        # == (-2*pi^2*sigma^2) / c2^2
    else:
        c1 = -2.0 * (jnp.pi ** 2) * sigma * sigma
    return jnp.stack([c1, c2]).astype(jnp.float32)


def cosine_kernel(t1, t2, sigma=1.0, mu=1.0, *, out_dtype=jnp.float32):
    """exp(-2*pi^2*sigma^2*(t1-t2)^2) * cos(2*pi*mu*(t1-t2)), broadcasting t1
    against t2 exactly like the PyTorch CosineKernel module."""
    t1 = jnp.asarray(t1, jnp.float32)
    t2 = jnp.asarray(t2, jnp.float32)
    out_shape = jnp.broadcast_shapes(t1.shape, t2.shape)
    total = math.prod(out_shape) if out_shape else 1
    if total == 0:
        return jnp.zeros(out_shape, out_dtype)

    plan = _broadcast_plan(t1.shape, t2.shape, out_shape)
    if plan is None:
        # TODO(synk): broadcast patterns needing more than one axis split
        # (e.g. (M,1,K) x (1,N,1)) are materialized in HBM before the kernel;
        # all common patterns are broadcast inside the kernel instead.
        t1, t2 = jnp.broadcast_arrays(t1, t2)
        plan = _broadcast_plan(t1.shape, t2.shape, out_shape)
    R, C, sa, sb, pad = plan

    a2 = _as_2d(t1, sa, pad)
    b2 = _as_2d(t2, sb, pad)

    thin = (a2.size + b2.size) < (R * C)     # pairwise-style (write-dominated)
    mu_c = _concrete_float(mu)
    prescale = thin and (mu_c is not None) and abs(mu_c) > 1e-12

    params = _params(sigma, mu, prescale)
    out = _launch(params, a2, b2, R, C, thin, prescale, out_dtype)

    if pad:
        out = out.reshape(-1)[:total]
    return out.reshape(out_shape)


# ---------------------------------------------------------------------------
# Self-test
# ---------------------------------------------------------------------------
if __name__ == "__main__":
    key = jax.random.PRNGKey(0)
    k1, k2, k3, k4, k5, k6 = jax.random.split(key, 6)
    sigma, mu = 1.0, 1.0   # matches nn.Parameter(torch.tensor(1.0)) defaults

    def reference(x, y):
        d = jnp.abs(x - y)
        return (jnp.exp(-2.0 * (jnp.pi ** 2) * (sigma ** 2) * d ** 2)
                * jnp.cos(2.0 * jnp.pi * d * mu))

    cases = []

    # 1) same-shape elementwise (lane/sublane-dense flatten path)
    a = jax.random.uniform(k1, (2, 8, 128), dtype=jnp.float32)
    b = jax.random.uniform(k2, (2, 8, 128), dtype=jnp.float32)
    cases.append(("elementwise", cosine_kernel(a, b, sigma, mu), reference(a, b)))

    # 2) pairwise Gram: (64,1) x (1,96) -> in-kernel broadcast + c2 pre-scale
    ta = jax.random.uniform(k3, (64, 1), dtype=jnp.float32)
    tb = jax.random.uniform(k4, (1, 96), dtype=jnp.float32)
    cases.append(("gram", cosine_kernel(ta, tb, sigma, mu), reference(ta, tb)))

    # 3) (M,1) vs (M,N): column operand broadcast inside the kernel
    tc = jax.random.uniform(k5, (16, 1), dtype=jnp.float32)
    td = jax.random.uniform(k6, (16, 128), dtype=jnp.float32)
    cases.append(("col_bcast", cosine_kernel(tc, td, sigma, mu), reference(tc, td)))

    # 4) leading batch dim of 1 broadcast in-kernel
    cases.append(("batch1", cosine_kernel(a[:1], b, sigma, mu), reference(a[:1], b)))

    # 5) scalar second operand (kept as a (1,1) block, no materialization)
    s = jnp.float32(0.25)
    cases.append(("scalar", cosine_kernel(a, s, sigma, mu), reference(a, s)))

    # 6) odd size -> padded lane-dense slab, sliced after the call
    e = jax.random.uniform(k1, (5, 7), dtype=jnp.float32)
    f = jax.random.uniform(k2, (5, 7), dtype=jnp.float32)
    cases.append(("odd", cosine_kernel(e, f, sigma, mu), reference(e, f)))

    for name, got, want in cases:
        got = jax.block_until_ready(got)
        assert got.shape == want.shape, f"{name}: shape {got.shape} vs {want.shape}"
        assert got.dtype == want.dtype, f"{name}: dtype {got.dtype} vs {want.dtype}"
        assert jnp.allclose(got, want, atol=2e-5, rtol=1e-5), f"{name}: mismatch"

    print("KERNEL_OK")
</pallas_src>

<mosaic_0001>
module attributes {stable_mosaic.version = 11 : i64} {
  func.func @_body_standard(%arg0: i32, %arg1: i32, %arg2: memref<2xf32, #tpu.memory_space<smem>>, %arg3: memref<8x128xf32, #tpu.memory_space<vmem>>, %arg4: memref<8x128xf32, #tpu.memory_space<vmem>>, %arg5: memref<8x128xf32, #tpu.memory_space<vmem>>) attributes {dimension_semantics = [#tpu.dimension_semantics<parallel>, #tpu.dimension_semantics<parallel>], iteration_bounds = array<i64: 1, 2>, scalar_prefetch = 0 : i64, scratch_operands = 0 : i64, tpu.core_type = #tpu.core_type<tc>, window_params = [{transform_indices = @transform_0, window_bounds = array<i64: 2>}, {transform_indices = @transform_1, window_bounds = array<i64: 8, 128>}, {transform_indices = @transform_2, window_bounds = array<i64: 8, 128>}, {transform_indices = @transform_3, window_bounds = array<i64: 8, 128>}]} {
    %c0 = arith.constant 0 : index
    %0 = memref.load %arg2[%c0] : memref<2xf32, #tpu.memory_space<smem>>
    %c1 = arith.constant 1 : index
    %1 = memref.load %arg2[%c1] : memref<2xf32, #tpu.memory_space<smem>>
    %c0_0 = arith.constant 0 : index
    %c0_1 = arith.constant 0 : index
    %2 = vector.load %arg3[%c0_0, %c0_1] : memref<8x128xf32, #tpu.memory_space<vmem>>, vector<8x128xf32>
    %c0_2 = arith.constant 0 : index
    %c0_3 = arith.constant 0 : index
    %3 = vector.load %arg4[%c0_2, %c0_3] : memref<8x128xf32, #tpu.memory_space<vmem>>, vector<8x128xf32>
    %4 = arith.subf %2, %3 : vector<8x128xf32>
    %5 = arith.mulf %4, %4 : vector<8x128xf32>
    %6 = vector.broadcast %0 : f32 to vector<8x128xf32>
    %7 = arith.mulf %6, %5 : vector<8x128xf32>
    %8 = math.exp %7 : vector<8x128xf32>
    %9 = vector.broadcast %1 : f32 to vector<8x128xf32>
    %10 = arith.mulf %9, %4 : vector<8x128xf32>
    %11 = math.cos %10 : vector<8x128xf32>
    %12 = arith.mulf %8, %11 : vector<8x128xf32>
    %c0_4 = arith.constant 0 : index
    %c0_5 = arith.constant 0 : index
    %13 = vector.load %arg5[%c0_4, %c0_5] : memref<8x128xf32, #tpu.memory_space<vmem>>, vector<8x128xf32>
    tpu.vector_store %arg5[%c0_4, %c0_5], %12 {strides = array<i32>} : memref<8x128xf32, #tpu.memory_space<vmem>>, vector<8x128xf32>,
    return
  }
  func.func @transform_0(%arg0: i32, %arg1: i32) -> i32 {
    %c0_i32 = arith.constant 0 : i32
    %c0_i32_0 = arith.constant 0 : i32
    return %c0_i32 : i32
  }
  func.func @transform_1(%arg0: i32, %arg1: i32) -> (i32, i32) {
    %c0_i32 = arith.constant 0 : i32
    return %arg0, %arg1 : i32, i32
  }
  func.func @transform_2(%arg0: i32, %arg1: i32) -> (i32, i32) {
    %c0_i32 = arith.constant 0 : i32
    return %arg0, %arg1 : i32, i32
  }
  func.func @transform_3(%arg0: i32, %arg1: i32) -> (i32, i32) {
    %c0_i32 = arith.constant 0 : i32
    return %arg0, %arg1 : i32, i32
  }
}

</mosaic_0001>

<bundles_post_ra>
// kernel: tpu_custom_call.1
= control target key start
LH: loop header
LB: loop body
LE: loop exit
PB: predicated region body
PF: predicated region fallthrough
CT: control target
= control target key end

     0   :  { %s1112_s0 = inlined_call_operand.hbm [shape: f32[2], index: 0, kind: input, shape index: {}]   ;;  %s1113_s1 = inlined_call_operand.hbm [shape: f32[8,256], index: 1, kind: input, shape index: {}]   ;;  %s1114_s2 = inlined_call_operand.hbm [shape: f32[8,256], index: 2, kind: input, shape index: {}]   ;;  %s1115_s3 = inlined_call_operand.hbm [shape: f32[8,256], index: 3, kind: output, shape index: {}]  }
   0x1   :  { %1122 = sst [smem:[#allocation14_spill]] %s1112_s0 }
   0x2   :  { %1123 = sst [smem:[#allocation15_spill]] %s1113_s1 }
   0x3   :  { %8 = vsyncpa [#allocation5], 0 }
   0x4   :  { %9 = vsyncpa [#allocation3], 0 }
   0x5   :  { %11 = vsyncpa [#allocation3 + $0x1], 0 }
   0x6   :  { %12 = vsyncpa [#allocation8], 0 }
   0x7   :  { %14 = vsyncpa [#allocation8 + $0x1], 0 }
   0x8   :  { %15 = vsyncpa [#allocation4], 0 }
   0x9   :  { %17 = vsyncpa [#allocation4 + $0x1], 0  ;;  %s821_s12 = smov 0   ;;  %s823_s13 = smov 0  }
   0xa   :  { %s825_s14 = smov 0   ;;  %s827_s15 = smov 0  }
   0xb   :  { %s829_s16 = smov 0   ;;  %s831_s17 = smov 0  }
   0xc LB: > { %s509_s18 = sadd.s32 4294967295, %s789_s17   ;;  %s510_s19 = sadd.s32 4294967294, %s789_s17   ;;  %s789_s17 = sphi %s831_s17, %s23_s17   ;;  %s785_s16 = sphi %s829_s16, %s1146_s16   ;;  %s781_s15 = sphi %s827_s15, %s1145_s15   ;;  %s777_s14 = sphi %s825_s14, %s1144_s14   ;;  %s773_s13 = sphi %s823_s13, %s1143_s13   ;;  %s769_s12 = sphi %s821_s12, %s1142_s12  }
   0xd   : > { %p72_p0 = scmp.ne.s32.totalorder %s777_s14, %s773_s13  ;;  %p78_p1 = scmp.ne.s32.totalorder %s773_s13, %s769_s12 }
   0xe   : > { %p857_p2 = scmp.eq.s32.totalorder %s509_s18, 0  ;;  %p132_p3 = scmp.eq.s32.totalorder %s509_s18, 1 }
   0xf   : > { %p138_p4 = scmp.eq.s32.totalorder %s510_s19, 1  ;;  %p511_p5 = scmp.ge.s32.totalorder %s789_s17, 1 }
  0x10   : > { %s1124_s20 = scalar_select %p857_p2, 1, 0 }
  0x11   : > { %p864_p6 = por %p857_p2, %p78_p1  ;;  %p871_p7 = por %p132_p3, %p72_p0 }
  0x12   : > { %p875_p8 = por %p138_p4, %p78_p1  ;;  %p145_p9 = scmp.lt.s32.totalorder %s789_s17, 3 }
  0x13   : > { %s1125_s21 = scalar_select %p864_p6, 1, 0 }
  0x14   : > { %s1126_s22 = scalar_select %p871_p7, 1, 0 }
  0x15   : > { %s1127_s23 = scalar_select %p875_p8, 1, 0 }
  0x16   : > { %p880_p10 = pnand %p511_p5, %p145_p9  ;;  %s65_s25 = sadd.s32 1, %s777_s14 }
  0x17   : > { %s32_s26 = sadd.s32 1, %s785_s16  ;;  %p73_p13 = scmp.eq.s32.totalorder %s789_s17, 0 }
  0x18   : > { %s1128_s24 = scalar_select %p880_p10, 1, 0 }
  0x19   : > { %p546_p12 = pneg %p880_p10  ;;  %p896_p1 = scmp.ge.s32.totalorder %s32_s26, 2 }
  0x1a   : > { %p903_p4 = por %p73_p13, %p72_p0  ;;  %p562_p5 = scmp.lt.s32.totalorder %s789_s17, 2 }
  0x1b   : > { %p892_p3 = pnand %p546_p12, %p857_p2  ;;  %s909_s30 = sand.u32 1, %s777_s14  }
  0x1c   : > { %s1132_s0 = sld [smem:[#allocation14_spill]] }
  0x1d   : > { %p628_p12 = pneg %p892_p3 }
  0x22   : > { %s626_s6 = scalar_lea.hbm %s1132_s0, 16 }
  0x23   : > { %p627_p9 = scmp.ne.s32.totalorder %s1132_s0, %s626_s6  ;;  %p633_p0 = scmp.lt.u32.totalorder %s626_s6, %s1132_s0 }
  0x25   : > { %p629_p11 = pnand %p628_p12, %p627_p9 }
  0x27   : > { %p630_p8 = pneg %p629_p11 }
  0x29   : > { %p635_p13 = pnand %p633_p0, %p630_p8 }
  0x2b   : > { %638 = shalt.err (!%p635_p13)
}
  0x2c   : > { %s791_s11 = smov [#allocation2]   ;;  %s1148_s26 = smov (%p896_p1, %s32_s26), 0 }
  0x2d   : > { %549 = dma.hbm_to_smem (!%p892_p3), %s1132_s0, 16, %s791_s11, [#allocation5]  }
  0x2e   : > { %s1116_s4 = sshll.u32 %s909_s30, 3  ;;  %s61_s5 = ssub.s32 %s785_s16, %s1148_s26 }
  0x2f   : > { %p63_p8 = scmp.eq.s32.totalorder %s61_s5, 0  ;;  %s515_s27 = sshll.u32 %s785_s16, 7 }
  0x30   : > { %s1133_s1 = sld [smem:[#allocation15_spill]]  ;;  %s171_s9 = scalar_lea.vmem [#allocation6], %s1116_s4 }
  0x31   : > { %s180_s10 = sshll.u32 %s171_s9, 4  ;;  %p951_p11 = pnand %p562_p5, %p903_p4  ;;  %s945_s10 = int_to_ptr.vmem [resolvable:$true] %s180_s10 }
  0x32   : > { %s943_s28 = scalar_select %p63_p8, %s777_s14, %s65_s25  }
  0x33   : > { %s958_s5 = scalar_lea.hbm %s1114_s2, %s515_s27  ;;  %s168_s6 = scalar_lea.sflag [#allocation3], %s909_s30 }
  0x34   : > { %p641_p1 = pneg %p951_p11 }
  0x36   : > { %s938_s8 = scalar_lea.hbm %s1133_s1, %s515_s27  ;;  %s644_s9 = scalar_lea.hbm %s1133_s1, 256 }
  0x37   : > { %s639_s7 = scalar_lea.hbm %s938_s8, 128  ;;  %p645_p4 = scmp.lt.u32.totalorder %s938_s8, %s1133_s1 }
  0x38   : > { %p640_p3 = scmp.ne.s32.totalorder %s938_s8, %s639_s7  ;;  %p646_p5 = scmp.lt.u32.totalorder %s644_s9, %s639_s7 }
  0x39   : > { %p648_p13 = scmp.lt.u32.totalorder %s639_s7, %s938_s8 }
  0x3a   : > { %p642_p9 = pnand %p641_p1, %p640_p3  ;;  %p647_p0 = por %p646_p5, %p645_p4 }
  0x3c   : > { %p643_p12 = pneg %p642_p9  ;;  %p649_p8 = por %p648_p13, %p647_p0 }
  0x3e   : > { %p650_p7 = pnand %p649_p8, %p643_p12 }
  0x40   : > { %653 = shalt.err (!%p650_p7)
}
  0x41   : > { %s654_s27 = scalar_lea.vmem %s945_s10, 128  ;;  %s792_s18 = smov [#allocation6]  }
  0x42   : > { %p655_p3 = scmp.ne.s32.totalorder %s945_s10, %s654_s27  ;;  %s659_s19 = sshll.u32 %s792_s18, 4  ;;  %s660_s19 = int_to_ptr.vmem [resolvable:$false] %s659_s19 }
  0x43   : > { %s661_s0 = scalar_lea.vmem %s660_s19, 256  ;;  %p662_p2 = scmp.lt.s32.totalorder %s945_s10, %s660_s19 }
  0x44   : > { %p657_p9 = pnand %p655_p3, %p641_p1  ;;  %p663_p4 = scmp.lt.s32.totalorder %s661_s0, %s654_s27 }
  0x46   : > { %p658_p6 = pneg %p657_p9  ;;  %p664_p5 = por %p663_p4, %p662_p2 }
  0x48   : > { %p665_p0 = pnand %p664_p5, %p658_p6 }
  0x4a   : > { %668 = shalt.err (!%p665_p0)
}
  0x4b   : > { %553 = dma.hbm_to_vmem [thread:$0]  (!%p951_p11), %s938_s8, 128, %s945_s10, %s168_s6  }
  0x4c   : > { %s1135_s4 = sshll.u32 %s909_s30, 3  ;;  %s188_s29 = scalar_lea.sflag [#allocation8], %s909_s30 }
  0x4d   : > { %s191_s7 = scalar_lea.vmem [#allocation7], %s1135_s4  ;;  %s669_s9 = scalar_lea.hbm %s958_s5, 128 }
  0x4e   : > { %s200_s25 = sshll.u32 %s191_s7, 4  ;;  %p670_p2 = scmp.ne.s32.totalorder %s958_s5, %s669_s9  ;;  %s201_s25 = int_to_ptr.vmem [resolvable:$true] %s200_s25 }
  0x4f   : > { %s674_s19 = scalar_lea.hbm %s1114_s2, 256  ;;  %p675_p12 = scmp.lt.u32.totalorder %s958_s5, %s1114_s2 }
  0x50   : > { %p672_p6 = pnand %p670_p2, %p641_p1  ;;  %p676_p13 = scmp.lt.u32.totalorder %s674_s19, %s669_s9 }
  0x51   : > { %p678_p3 = scmp.lt.u32.totalorder %s669_s9, %s958_s5 }
  0x52   : > { %p673_p7 = pneg %p672_p6  ;;  %p677_p8 = por %p676_p13, %p675_p12 }
  0x54   : > { %p679_p9 = por %p678_p3, %p677_p8 }
  0x56   : > { %p680_p4 = pnand %p679_p9, %p673_p7 }
  0x58   : > { %683 = shalt.err (!%p680_p4)
}
  0x59   : > { %s684_s30 = scalar_lea.vmem %s201_s25, 128  ;;  %s793_s8 = smov [#allocation7]  }
  0x5a   : > { %p685_p5 = scmp.ne.s32.totalorder %s201_s25, %s684_s30  ;;  %s689_s10 = sshll.u32 %s793_s8, 4  ;;  %s690_s10 = int_to_ptr.vmem [resolvable:$false] %s689_s10 }
  0x5b   : > { %s691_s6 = scalar_lea.vmem %s690_s10, 256  ;;  %p692_p6 = scmp.lt.s32.totalorder %s201_s25, %s690_s10 }
  0x5c   : > { %p687_p0 = pnand %p685_p5, %p641_p1  ;;  %p693_p10 = scmp.lt.s32.totalorder %s691_s6, %s684_s30 }
  0x5e   : > { %p688_p2 = pneg %p687_p0  ;;  %p694_p12 = por %p693_p10, %p692_p6 }
  0x60   : > { %p695_p13 = pnand %p694_p12, %p688_p2 }
  0x62   : > { %698 = shalt.err (!%p695_p13)
}
  0x63   : > { %556 = dma.hbm_to_vmem [thread:$0]  (!%p951_p11), %s958_s5, 128, %s201_s25, %s188_s29  }
  0x64   : > { %p1136_p7 = scmp.ne.s32.totalorder %s1128_s24, 0 }
  0x65   : > { %p1137_p8 = scmp.ne.s32.totalorder (!%p1136_p7), %s1124_s20, 0 }
  0x66   : > { %209 = sbr.rel (%p1136_p7) target bundleno = 223 (0xdf), region = 32 }
  0x6d   : > { %752 = dma.done.wait (%p1137_p8), [#allocation5], 16  }
  0x6e   : > { %754 = vsyncadd (%p1137_p8), [#allocation5], 4294967280  ;;  %s1015_s1 = sand.u32 1, %s773_s13   ;;  %p1138_p10 = scmp.ne.s32.totalorder %s1125_s21, 0 }
  0x6f   : > { %s1018_s4 = sshll.u32 %s1015_s1, 3  ;;  %s216_s11 = scalar_lea.sflag [#allocation3], %s1015_s1 }
  0x70   : > { %s219_s5 = scalar_lea.vmem [#allocation6], %s1018_s4 }
  0x71   : > { %756 = dma.done.wait (%p1138_p10), %s216_s11, 128  }
  0x72   : > { %758 = vsyncadd (%p1138_p10), %s216_s11, 4294967168  ;;  %s225_s20 = scalar_lea.sflag [#allocation8], %s1015_s1  ;;  %s228_s24 = scalar_lea.vmem [#allocation7], %s1018_s4 }
  0x73   : > { %760 = dma.done.wait (%p1138_p10), %s225_s20, 128  }
  0x74   : > { %762 = vsyncadd (%p1138_p10), %s225_s20, 4294967168 }
  0x75   : > { %233 = sfence }
  0x76   : > { %s523_s7 = sld [smem:[#allocation2 + $0x1]]  ;;  %v259_v0 = vld [vmem:[%s219_s5] sm:$0xff]  ;;  %v260_v1 = vld [vmem:[%s228_s24] sm:$0xff]  ;;  %v794_v16 = vmov 683565275   ;;  %s257_s21 = sld [smem:[#allocation2]] }
  0x77   : > { %v1032_v2 = vsub.f32 %v259_v0, %v260_v1  ;;  %v795_v18 = vmov 2475754826   ;;  %v796_v20 = vmov 2131351028   ;;  %v797_v22 = vmov 2102212464  }
  0x78   : > { %v798_v24 = vmov 920167782   ;;  %v799_v31 = vmov 1326507024   ;;  %s256_s25 = scalar_lea.vmem [#allocation9], %s1018_s4  ;;  %s529_s9 = sshll.u32 %s781_s15, 7 }
  0x79   : > { %s390_s29 = sshll.u32 %s256_s25, 4  ;;  %s1065_s19 = scalar_lea.hbm %s1115_s3, %s529_s9  ;;  %s1060_s29 = int_to_ptr.vmem [resolvable:$true] %s390_s29 }
  0x7a   : > { %s375_s0 = scalar_lea.sflag [#allocation4], %s1015_s1  ;;  %s699_s30 = scalar_lea.vmem %s1060_s29, 128 }
  0x7b   : > { %p700_p11 = scmp.ne.s32.totalorder %s1060_s29, %s699_s30  ;;  %p1139_p1 = scmp.ne.s32.totalorder %s1126_s22, 0 }
  0x7c   : > { %v267_v3 = vstv %s523_s7  ;;  %s800_s15 = smov [#allocation9]  }
  0x7d   : > { %v1035_v4 = vmul.f32 %v267_v3, %v1032_v2  ;;  %p701_p3 = pnand %p700_p11, %p1139_p1  ;;  %s703_s8 = sshll.u32 %s800_s15, 4  ;;  %s704_s8 = int_to_ptr.vmem [resolvable:$false] %s703_s8 }
  0x7e   : > { %s705_s10 = scalar_lea.vmem %s704_s8, 256  ;;  %p706_p4 = scmp.lt.s32.totalorder %s1060_s29, %s704_s8 }
  0x7f   : > { %v272_v5 = vand.u32 2139095040, %v1035_v4  ;;  %v269_v7 = vand.u32 2147483647, %v1035_v4  ;;  %vm271_vm7 = vcmp.lt.s32.totalorder %v1035_v4, 0  ;;  %vm361_vm12 = vweird.f32 %v1035_v4  ;;  %p702_p9 = pneg %p701_p3  ;;  %p707_p5 = scmp.lt.s32.totalorder %s705_s10, %s699_s30 }
  0x81   : > { %v273_v6 = vshrl.u32 %v272_v5, 23  ;;  %v276_v10 = vand.u32 8388607, %v269_v7  ;;  %vm270_vm8 = vcmp.le.f32.partialorder %v269_v7, 0.7853982  ;;  %p708_p0 = por %p707_p5, %p706_p4 }
  0x83   : > { %v524_v8 = vadd.s32 4294967169, %v273_v6  ;;  %v277_v13 = vor.u32 8388608, %v276_v10  ;;  %p709_p2 = pnand %p708_p0, %p702_p9 }
  0x85   : > { %v279_v9 = vadd.s32 1, %v524_v8  ;;  %v317_v33 = vshll.u32 %v277_v13, 8 }
  0x87   : > { %vm280_vm0 = vcmp.gt.s32.totalorder %v279_v9, 0 }
  0x88   : > { %v281_v11 = vsel %vm280_vm0, %v279_v9, 0 }
  0x89   : > { %v283_v12 = vand.u32 31, %v281_v11  ;;  %v282_v14 = vshrl.u32 %v281_v11, 5 }
  0x8b   : > { %v284_v15 = vsub.s32 32, %v283_v12  ;;  %v286_v17 = vshll.u32 %v794_v16, %v283_v12  ;;  %v289_v19 = vshll.u32 %v795_v18, %v283_v12  ;;  %v292_v21 = vshll.u32 %v796_v20, %v283_v12 }
  0x8c   : > { %v295_v23 = vshll.u32 %v797_v22, %v283_v12  ;;  %v298_v25 = vshll.u32 %v798_v24, %v283_v12  ;;  %vm301_vm1 = vcmp.lt.s32.totalorder %v282_v14, 1  ;;  %vm304_vm2 = vcmp.lt.s32.totalorder %v282_v14, 4 }
  0x8d   : > { %v285_v26 = vshrl.u32 %v794_v16, %v284_v15  ;;  %v287_v27 = vshrl.u32 %v795_v18, %v284_v15  ;;  %v290_v28 = vshrl.u32 %v796_v20, %v284_v15  ;;  %v293_v29 = vshrl.u32 %v797_v22, %v284_v15 }
  0x8e   : > { %v296_v30 = vshrl.u32 %v798_v24, %v284_v15  ;;  %v299_v32 = vshrl.u32 %v799_v31, %v284_v15  ;;  %vm302_vm3 = vcmp.lt.s32.totalorder %v282_v14, 2  ;;  %vm303_vm4 = vcmp.lt.s32.totalorder %v282_v14, 3 }
  0x8f   : > { %v288_v34 = vor.u32 %v287_v27, %v286_v17  ;;  %v291_v35 = vor.u32 %v290_v28, %v289_v19  ;;  %v294_v36 = vor.u32 %v293_v29, %v292_v21  ;;  %v262_v17 = vmul.f32 %v1032_v2, %v1032_v2 }
  0x90   : > { %v297_v37 = vor.u32 %v296_v30, %v295_v23  ;;  %v300_v38 = vor.u32 %v299_v32, %v298_v25  ;;  %v263_v19 = vstv %s257_s21 }
  0x91   : > { %v305_v39 = vsel %vm301_vm1, %v285_v26, %v288_v34  ;;  %v306_v40 = vsel %vm304_vm2, %v294_v36, 2102212464  ;;  %v309_v41 = vsel %vm301_vm1, %v288_v34, %v291_v35  ;;  %v313_v42 = vsel %vm301_vm1, %v291_v35, %v294_v36 }
  0x92   : > { %v307_v43 = vsel %vm303_vm4, %v291_v35, %v306_v40  ;;  %v310_v44 = vsel %vm304_vm2, %v297_v37, 920167782  ;;  %v314_v45 = vsel %vm304_vm2, %v300_v38, 1326507024  ;;  %v264_v21 = vmul.f32 %v263_v19, %v262_v17 }
  0x93   : > { %v311_v46 = vsel %vm303_vm4, %v294_v36, %v310_v44  ;;  %v315_v47 = vsel %vm303_vm4, %v297_v37, %v314_v45  ;;  %v308_v48 = vsel %vm302_vm3, %v305_v39, %v307_v43 }
  0x94   : > { %v312_v49 = vsel %vm302_vm3, %v309_v41, %v311_v46  ;;  %v316_v50 = vsel %vm302_vm3, %v313_v42, %v315_v47  ;;  %v324_v55 = vmul.u32 %v317_v33, %v308_v48  ;;  %v265_v26 = vmul.f32 1.442695, %v264_v21 }
  0x95   : > { %v1041_v51 = vmul.u32.u64.low %v317_v33, %v316_v50  ;;  %v1042_v52 = vmul.u32.u64.high %v317_v33, %v316_v50, %v1041_v51  ;;  %v1044_v53 = vmul.u32.u64.low %v317_v33, %v312_v49  ;;  %v1045_v54 = vmul.u32.u64.high %v317_v33, %v312_v49, %v1044_v53 }
  0x97   : > { %vm326_vm5 = vc.u32 %v1042_v52, %v1044_v53  ;;  %v327_v56 = vadd.s32 1, %v1045_v54  ;;  %v325_v5 = vadd.s32 %v1044_v53, %v1042_v52 }
  0x99   : > { %v328_v57 = vsel %vm326_vm5, %v327_v56, %v1045_v54 }
  0x9a   : > { %v329_v58 = vadd.s32 %v328_v57, %v324_v55 }
  0x9c   : > { %v330_v59 = vadd.s32 536870912, %v329_v58 }
  0x9e   : > { %v331_v60 = vshrl.u32 %v330_v59, 30 }
  0xa0   : > { %v332_v61 = vshll.u32 %v331_v60, 30  ;;  %v355_v23 = vsub.s32 4, %v331_v60 }
  0xa2   : > { %v333_v62 = vsub.s32 %v329_v58, %v332_v61  ;;  %v356_v27 = vsel %vm271_vm7, %v355_v23, %v331_v60 }
  0xa3   : > { %v358_v2 = vsel %vm270_vm8, 0, %v356_v27 }
  0xa4   : > { %v335_v63 = vsub.s32 0, %v333_v62  ;;  %v362_v28 = vand.u32 3, %v358_v2 }
  0xa6   : > { %v525_v0 = vmin.u32 %v335_v63, %v333_v62  ;;  %vm367_vm9 = vcmp.eq.s32.totalorder %v362_v28, 2  ;;  %vm364_vm10 = vcmp.eq.s32.totalorder %v362_v28, 0  ;;  %vm363_vm11 = vcmp.lt.s32.totalorder %v362_v28, 2 }
  0xa8   : > { %v337_v1 = vclz %v525_v0 }
  0xaa   : > { %v526_v3 = vadd.s32 4294967294, %v337_v1 }
  0xac   : > { %vm527_vm6 = vcmp.lt.s32.totalorder %v526_v3, 0 }
  0xad   : > { %v340_v6 = vsel %vm527_vm6, 0, %v526_v3 }
  0xae   : > { %v341_v8 = vsub.s32 32, %v340_v6  ;;  %v342_v9 = vshll.u32 %v333_v62, %v340_v6  ;;  %v345_v10 = vsub.s32 4294967266, %v340_v6 }
  0xb0   : > { %v343_v11 = vshrl.u32 %v325_v5, %v341_v8  ;;  %v346_v12 = vadd.s32 127, %v345_v10 }
  0xb2   : > { %v344_v13 = vor.u32 %v343_v11, %v342_v9  ;;  %v347_v14 = vshll.u32 %v346_v12, 23 }
  0xb4   : > { %v348_v15 = vor.u32 4788187, %v347_v14  ;;  %v351_v16 = vcvt.s32.f32 %v344_v13 }
  0xb6   : > { %v349_v18 = vand.u32 2147483647, %v348_v15 }
  0xb8   : > { %v352_v20 = vmul.f32 %v351_v16, %v349_v18 }
  0xba   : > { %v353_v22 = vxor.u32 2147483648, %v352_v20 }
  0xbc   : > { %v354_v24 = vsel %vm271_vm7, %v353_v22, %v352_v20 }
  0xbd   : > { %v357_v25 = vsel %vm270_vm8, %v1035_v4, %v354_v24 }
  0xbe   : > { %620 = vcosq.f32 %v357_v25 }
  0xbf   : > { %622 = vsinq.f32 %v357_v25 }
  0xc0   : > { %624 = vpow2.f32 %v265_v26 }
  0xc8   : > { %v621_v29 = vpop.eup %620 }
  0xc9   : > { %v623_v30 = vpop.eup %622  ;;  %v368_v31 = vxor.u32 2147483648, %v621_v29 }
  0xca   : > { %v365_v7 = vxor.u32 2147483648, %v623_v30  ;;  %v625_v33 = vpop.eup %624 }
  0xcb   : > { %v369_v32 = vsel %vm367_vm9, %v368_v31, %v623_v30 }
  0xcc   : > { %v366_v34 = vsel %vm364_vm10, %v621_v29, %v365_v7 }
  0xcd   : > { %v370_v35 = vsel %vm363_vm11, %v366_v34, %v369_v32 }
  0xce   : > { %v371_v36 = vsel %vm361_vm12, nan, %v370_v35 }
  0xcf   : > { %v372_v37 = vmul.f32 %v625_v33, %v371_v36 }
  0xd1   : > { %373 = vst [vmem:[%s256_s25] sm:$0xff] %v372_v37 }
  0xd2   : > { %712 = shalt.err (!%p709_p2)
}
  0xd3   : > { %s713_s6 = scalar_lea.hbm %s1065_s19, 128  ;;  %s717_s11 = scalar_lea.hbm %s1115_s3, 256 }
  0xd4   : > { %p714_p6 = scmp.ne.s32.totalorder %s1065_s19, %s713_s6  ;;  %p718_p7 = scmp.lt.u32.totalorder %s1065_s19, %s1115_s3 }
  0xd5   : > { %p719_p8 = scmp.lt.u32.totalorder %s717_s11, %s713_s6  ;;  %p721_p11 = scmp.lt.u32.totalorder %s713_s6, %s1065_s19 }
  0xd6   : > { %p715_p12 = pnand %p714_p6, %p1139_p1 }
  0xd7   : > { %p720_p10 = por %p719_p8, %p718_p7 }
  0xd8   : > { %p716_p13 = pneg %p715_p12 }
  0xd9   : > { %p722_p3 = por %p721_p11, %p720_p10 }
  0xdb   : > { %p723_p9 = pnand %p722_p3, %p716_p13 }
  0xdd   : > { %726 = shalt.err (!%p723_p9)
}
  0xde   : > { %544 = dma.vmem_to_hbm [thread:$0]  (%p1139_p1), %s1060_s29, 128, %s1065_s19, %s375_s0  }
  0xdf PF: > { %s402_s24 = sand.u32 1, %s769_s12   ;;  %p1140_p4 = scmp.ne.s32.totalorder %s1127_s23, 0 }
  0xe0   : > { %p1141_p5 = scmp.ge.s32.totalorder %s789_s17, 2  ;;  %s403_s7 = scalar_lea.sflag [#allocation4], %s402_s24 }
  0xe2   : > { %p558_p0 = pnand %p1141_p5, %p1140_p4 }
  0xe4   : > { %764 = dma.done.wait (!%p558_p0), %s403_s7, 128  }
  0xe5   : > { %766 = vsyncadd (!%p558_p0), %s403_s7, 4294967168  ;;  %s23_s17 = sadd.s32 1, %s789_s17   ;;  %s1142_s12 = smov %s773_s13 }
  0xe6   : > { %p20_p2 = scmp.ge.s32.totalorder %s23_s17, 4   ;;  %s1143_s13 = smov %s777_s14 }
  0xe7   : > { %s1144_s14 = smov %s943_s28  ;;  %s1145_s15 = smov %s785_s16 }
  0xe8   : > { %s1146_s16 = smov %s1148_s26  ;;  %22 = sbr.rel (!%p20_p2) target bundleno = 12 (0xc), region = 95 }
  0xef   :  { %408 = vsyncpa [#allocation3], 1 }
  0xf0   :  { %410 = vsyncpa [#allocation3 + $0x1], 1 }
  0xf1   :  { %411 = vsyncpa [#allocation8], 1 }
  0xf2   :  { %413 = vsyncpa [#allocation8 + $0x1], 1 }
  0xf3   :  { %414 = vsyncpa [#allocation4], 1 }
  0xf4   :  { %416 = vsyncpa [#allocation4 + $0x1], 1 }
  0xf5   :  { %417 = vsyncpa [#allocation5], 1 }
  0xf6   :  { %419 = vsyncpa [#allocation5 + $0x1], 1 }

</bundles_post_ra>
